<compile_context>
chip_gen: v7x
topology: tpu7x:2x2x1
jax: 0.10.0
libtpu: 0.0.40
codegen_flags: <defaults>
</compile_context>

<pallas_src>
import jax
import jax.numpy as jnp
from jax.experimental import pallas as pl
from jax.experimental.pallas import tpu as pltpu


# ---------------------------------------------------------------------------
# Fused kernel: x -> L1 -> LReLU -> L2 -> LReLU -> L3 -> LReLU -> Lout -> sigmoid
# ---------------------------------------------------------------------------
def navacl_kernel(x_ref, w1_ref, b1_ref, w2_ref, b2_ref, w3_ref, b3_ref,
                  wo_ref, bo_ref, out_ref):
    # x_ref:  (B, D)          input task parameters
    # w*_ref: (in, out)       pre-transposed Linear weights
    # b*_ref: (1, out)        biases (row vectors for clean broadcast)
    # out_ref:(B, 1)          sigmoid output
    def leaky(h):
        return jnp.where(h >= 0.0, h, 0.1 * h)

    x = x_ref[...]
    h = leaky(jnp.dot(x, w1_ref[...],
                      preferred_element_type=jnp.float32) + b1_ref[...])
    h = leaky(jnp.dot(h, w2_ref[...],
                      preferred_element_type=jnp.float32) + b2_ref[...])
    h = leaky(jnp.dot(h, w3_ref[...],
                      preferred_element_type=jnp.float32) + b3_ref[...])
    o = jnp.dot(h, wo_ref[...],
                preferred_element_type=jnp.float32) + bo_ref[...]
    out_ref[...] = 1.0 / (1.0 + jnp.exp(-o))


# ---------------------------------------------------------------------------
# Wrapper: single pallas_call, whole batch, all operands VMEM-resident
# ---------------------------------------------------------------------------
def navacl_forward(x, params):
    B = x.shape[0]
    vmem = pl.BlockSpec(memory_space=pltpu.MemorySpace.VMEM)
    return pl.pallas_call(
        navacl_kernel,
        out_shape=jax.ShapeDtypeStruct((B, 1), jnp.float32),
        in_specs=[vmem] * 9,
        out_specs=vmem,
    )(x,
      params["w1"], params["b1"],
      params["w2"], params["b2"],
      params["w3"], params["b3"],
      params["wo"], params["bo"])


# ---------------------------------------------------------------------------
# Pure-JAX reference (matches PyTorch NavACLNetwork.forward semantics)
# ---------------------------------------------------------------------------
def navacl_ref(x, params):
    def leaky(h):
        return jnp.where(h >= 0.0, h, 0.1 * h)

    h = leaky(x @ params["w1"] + params["b1"])
    h = leaky(h @ params["w2"] + params["b2"])
    h = leaky(h @ params["w3"] + params["b3"])
    return jax.nn.sigmoid(h @ params["wo"] + params["bo"])


if __name__ == "__main__":
    # NavACLNetwork(task_param_dim=4, hidden_dim=32), batch of 2 task params.
    B, D, H = 2, 4, 32

    key = jax.random.PRNGKey(0)
    ks = jax.random.split(key, 9)

    def kaiming_uniform(k, fan_in, shape):
        bound = jnp.sqrt(6.0 / fan_in)
        return jax.random.uniform(k, shape, jnp.float32, -bound, bound)

    # Deterministic synthetic parameters in PyTorch (out_features, in_features)
    # layout, then converted to kernel-friendly (in, out) + (1, out) layouts.
    torch_layout = {
        "w1": kaiming_uniform(ks[0], D, (H, D)),
        "b1": 0.0005 * jax.random.normal(ks[1], (H,), jnp.float32),
        "w2": kaiming_uniform(ks[2], H, (H, H)),
        "b2": 0.0005 * jax.random.normal(ks[3], (H,), jnp.float32),
        "w3": kaiming_uniform(ks[4], H, (H, H)),
        "b3": 0.0005 * jax.random.normal(ks[5], (H,), jnp.float32),
        "wo": kaiming_uniform(ks[6], H, (1, H)),
        "bo": 0.0005 * jax.random.normal(ks[7], (1,), jnp.float32),
    }
    params = {
        "w1": torch_layout["w1"].T, "b1": torch_layout["b1"].reshape(1, H),
        "w2": torch_layout["w2"].T, "b2": torch_layout["b2"].reshape(1, H),
        "w3": torch_layout["w3"].T, "b3": torch_layout["b3"].reshape(1, H),
        "wo": torch_layout["wo"].T, "bo": torch_layout["bo"].reshape(1, 1),
    }

    x = jax.random.normal(ks[8], (B, D), jnp.float32)

    out = jax.jit(navacl_forward)(x, params)
    out = jax.block_until_ready(out)

    ref = navacl_ref(x, params)
    assert out.shape == (B, 1), out.shape
    assert bool(jnp.all((out > 0.0) & (out < 1.0))), "sigmoid range violated"
    assert jnp.allclose(out, ref, atol=1e-5, rtol=1e-5), \
        float(jnp.max(jnp.abs(out - ref)))

    print("KERNEL_OK")
</pallas_src>

<mosaic_0001>
module attributes {stable_mosaic.version = 11 : i64} {
  func.func @navacl_kernel(%arg0: memref<2x4xf32, #tpu.memory_space<vmem>>, %arg1: memref<4x32xf32, #tpu.memory_space<vmem>>, %arg2: memref<1x32xf32, #tpu.memory_space<vmem>>, %arg3: memref<32x32xf32, #tpu.memory_space<vmem>>, %arg4: memref<1x32xf32, #tpu.memory_space<vmem>>, %arg5: memref<32x32xf32, #tpu.memory_space<vmem>>, %arg6: memref<1x32xf32, #tpu.memory_space<vmem>>, %arg7: memref<32x1xf32, #tpu.memory_space<vmem>>, %arg8: memref<1x1xf32, #tpu.memory_space<vmem>>, %arg9: memref<2x1xf32, #tpu.memory_space<vmem>>) attributes {dimension_semantics = [], scalar_prefetch = 0 : i64, scratch_operands = 0 : i64, tpu.core_type = #tpu.core_type<tc>} {
    %c0 = arith.constant 0 : index
    %c0_0 = arith.constant 0 : index
    %0 = vector.load %arg0[%c0, %c0_0] : memref<2x4xf32, #tpu.memory_space<vmem>>, vector<2x4xf32>
    %c0_1 = arith.constant 0 : index
    %c0_2 = arith.constant 0 : index
    %1 = vector.load %arg1[%c0_1, %c0_2] : memref<4x32xf32, #tpu.memory_space<vmem>>, vector<4x32xf32>
    %cst = arith.constant dense<0.000000e+00> : vector<2x32xf32>
    %2 = tpu.matmul %0, %1, %cst {dimension_numbers = #tpu.dot_dimension_numbers<[1], [0], [0], [1], [0, 0, 1, 1], [], []>} : vector<2x4xf32>, vector<4x32xf32>, vector<2x32xf32> -> vector<2x32xf32>
    %c0_3 = arith.constant 0 : index
    %c0_4 = arith.constant 0 : index
    %3 = vector.load %arg2[%c0_3, %c0_4] : memref<1x32xf32, #tpu.memory_space<vmem>>, vector<1x32xf32>
    %4 = vector.broadcast %3 : vector<1x32xf32> to vector<2x32xf32>
    %5 = arith.addf %2, %4 : vector<2x32xf32>
    %cst_5 = arith.constant 0.000000e+00 : f32
    %6 = vector.broadcast %cst_5 : f32 to vector<2x32xf32>
    %7 = arith.cmpf oge, %5, %6 : vector<2x32xf32>
    %cst_6 = arith.constant 1.000000e-01 : f32
    %8 = vector.broadcast %cst_6 : f32 to vector<2x32xf32>
    %9 = arith.mulf %8, %5 : vector<2x32xf32>
    %10 = arith.select %7, %5, %9 : vector<2x32xi1>, vector<2x32xf32>
    %c0_7 = arith.constant 0 : index
    %c0_8 = arith.constant 0 : index
    %11 = vector.load %arg3[%c0_7, %c0_8] : memref<32x32xf32, #tpu.memory_space<vmem>>, vector<32x32xf32>
    %cst_9 = arith.constant dense<0.000000e+00> : vector<2x32xf32>
    %12 = tpu.matmul %10, %11, %cst_9 {dimension_numbers = #tpu.dot_dimension_numbers<[1], [0], [0], [1], [0, 0, 1, 1], [], []>} : vector<2x32xf32>, vector<32x32xf32>, vector<2x32xf32> -> vector<2x32xf32>
    %c0_10 = arith.constant 0 : index
    %c0_11 = arith.constant 0 : index
    %13 = vector.load %arg4[%c0_10, %c0_11] : memref<1x32xf32, #tpu.memory_space<vmem>>, vector<1x32xf32>
    %14 = vector.broadcast %13 : vector<1x32xf32> to vector<2x32xf32>
    %15 = arith.addf %12, %14 : vector<2x32xf32>
    %cst_12 = arith.constant 0.000000e+00 : f32
    %16 = vector.broadcast %cst_12 : f32 to vector<2x32xf32>
    %17 = arith.cmpf oge, %15, %16 : vector<2x32xf32>
    %cst_13 = arith.constant 1.000000e-01 : f32
    %18 = vector.broadcast %cst_13 : f32 to vector<2x32xf32>
    %19 = arith.mulf %18, %15 : vector<2x32xf32>
    %20 = arith.select %17, %15, %19 : vector<2x32xi1>, vector<2x32xf32>
    %c0_14 = arith.constant 0 : index
    %c0_15 = arith.constant 0 : index
    %21 = vector.load %arg5[%c0_14, %c0_15] : memref<32x32xf32, #tpu.memory_space<vmem>>, vector<32x32xf32>
    %cst_16 = arith.constant dense<0.000000e+00> : vector<2x32xf32>
    %22 = tpu.matmul %20, %21, %cst_16 {dimension_numbers = #tpu.dot_dimension_numbers<[1], [0], [0], [1], [0, 0, 1, 1], [], []>} : vector<2x32xf32>, vector<32x32xf32>, vector<2x32xf32> -> vector<2x32xf32>
    %c0_17 = arith.constant 0 : index
    %c0_18 = arith.constant 0 : index
    %23 = vector.load %arg6[%c0_17, %c0_18] : memref<1x32xf32, #tpu.memory_space<vmem>>, vector<1x32xf32>
    %24 = vector.broadcast %23 : vector<1x32xf32> to vector<2x32xf32>
    %25 = arith.addf %22, %24 : vector<2x32xf32>
    %cst_19 = arith.constant 0.000000e+00 : f32
    %26 = vector.broadcast %cst_19 : f32 to vector<2x32xf32>
    %27 = arith.cmpf oge, %25, %26 : vector<2x32xf32>
    %cst_20 = arith.constant 1.000000e-01 : f32
    %28 = vector.broadcast %cst_20 : f32 to vector<2x32xf32>
    %29 = arith.mulf %28, %25 : vector<2x32xf32>
    %30 = arith.select %27, %25, %29 : vector<2x32xi1>, vector<2x32xf32>
    %c0_21 = arith.constant 0 : index
    %c0_22 = arith.constant 0 : index
    %31 = vector.load %arg7[%c0_21, %c0_22] : memref<32x1xf32, #tpu.memory_space<vmem>>, vector<32x1xf32>
    %cst_23 = arith.constant dense<0.000000e+00> : vector<2x1xf32>
    %32 = tpu.matmul %30, %31, %cst_23 {dimension_numbers = #tpu.dot_dimension_numbers<[1], [0], [0], [1], [0, 0, 1, 1], [], []>} : vector<2x32xf32>, vector<32x1xf32>, vector<2x1xf32> -> vector<2x1xf32>
    %c0_24 = arith.constant 0 : index
    %c0_25 = arith.constant 0 : index
    %33 = vector.load %arg8[%c0_24, %c0_25] : memref<1x1xf32, #tpu.memory_space<vmem>>, vector<1x1xf32>
    %34 = vector.broadcast %33 : vector<1x1xf32> to vector<2x1xf32>
    %35 = arith.addf %32, %34 : vector<2x1xf32>
    %cst_26 = arith.constant 0.000000e+00 : f32
    %36 = vector.broadcast %cst_26 : f32 to vector<2x1xf32>
    %37 = arith.subf %36, %35 : vector<2x1xf32>
    %38 = math.exp %37 : vector<2x1xf32>
    %cst_27 = arith.constant 1.000000e+00 : f32
    %39 = vector.broadcast %cst_27 : f32 to vector<2x1xf32>
    %40 = arith.addf %39, %38 : vector<2x1xf32>
    %cst_28 = arith.constant 1.000000e+00 : f32
    %41 = vector.broadcast %cst_28 : f32 to vector<2x1xf32>
    %42 = arith.divf %41, %40 : vector<2x1xf32>
    %c0_29 = arith.constant 0 : index
    %c0_30 = arith.constant 0 : index
    %43 = vector.load %arg9[%c0_29, %c0_30] : memref<2x1xf32, #tpu.memory_space<vmem>>, vector<2x1xf32>
    tpu.vector_store %arg9[%c0_29, %c0_30], %42 {strides = array<i32>} : memref<2x1xf32, #tpu.memory_space<vmem>>, vector<2x1xf32>,
    return
  }
}

</mosaic_0001>

<bundles_post_ra>
// kernel: navacl_forward.1
= control target key start
LH: loop header
LB: loop body
LE: loop exit
PB: predicated region body
PF: predicated region fallthrough
CT: control target
= control target key end

     0   :  { %s646_s0 = inlined_call_operand.vmem [shape: f32[2,4], index: 0, kind: input, shape index: {}]   ;;  %s647_s1 = inlined_call_operand.vmem [shape: f32[4,32], index: 1, kind: input, shape index: {}]   ;;  %s648_s2 = inlined_call_operand.vmem [shape: f32[1,32], index: 2, kind: input, shape index: {}]   ;;  %s649_s3 = inlined_call_operand.vmem [shape: f32[32,32], index: 3, kind: input, shape index: {}]   ;;  %s650_s4 = inlined_call_operand.vmem [shape: f32[1,32], index: 4, kind: input, shape index: {}]   ;;  %s651_s5 = inlined_call_operand.hbm [shape: f32[32,32], index: 5, kind: input, shape index: {}]   ;;  %s652_s6 = inlined_call_operand.vmem [shape: f32[1,32], index: 6, kind: input, shape index: {}]   ;;  %s653_s7 = inlined_call_operand.vmem [shape: f32[32,1], index: 7, kind: input, shape index: {}]   ;;  %s654_s8 = inlined_call_operand.<no memory space> [shape: f32[1,1], index: 8, kind: input, shape index: {}]   ;;  %s655_s9 = inlined_call_operand.vmem [shape: f32[2,1], index: 9, kind: output, shape index: {}]  }
   0x1   :  { %v14_v0 = vstv %s654_s8 }
   0x2   :  { %15 = vst [vmem:[#allocation2] sm:$0x1] %v14_v0 }
   0x3   :  { %16 = vsyncpa [#allocation4], 0  ;;  %s526_s11 = smov [#allocation3]   ;;  %s502_s15 = scalar_lea.hbm %s651_s5, 512 }
   0x4   :  { %s32_s12 = sshll.u32 %s526_s11, 4  ;;  %p503_p0 = scmp.ne.s32.totalorder %s651_s5, %s502_s15  ;;  %s33_s12 = int_to_ptr.vmem [resolvable:$true] %s32_s12 }
   0x5   :  { %p506_p1 = scmp.lt.u32.totalorder %s502_s15, %s651_s5 }
   0x7   :  { %p508_p2 = pnand %p506_p1, %p503_p0 }
   0x9   :  { %511 = shalt.err (!%p508_p2)
}
   0xa   :  { %s512_s8 = scalar_lea.vmem %s33_s12, 512  ;;  %p517_p4 = scmp.lt.s32.totalorder %s33_s12, %s33_s12 }
   0xb   :  { %p513_p3 = scmp.ne.s32.totalorder %s33_s12, %s512_s8  ;;  %p518_p5 = scmp.lt.s32.totalorder %s512_s8, %s512_s8 }
   0xd   :  { %p519_p6 = por %p518_p5, %p517_p4 }
   0xf   :  { %p520_p7 = pnand %p519_p6, %p513_p3 }
  0x11   :  { %523 = shalt.err (!%p520_p7)
}
  0x12   :  { %s527_s20 = smov 128   ;;  %s528_s21 = smov 8  }
  0x13   :  { %38 = dma.hbm_to_vmem [thread:$0]  %s651_s5, 512, %s33_s12, [#allocation4], %s527_s20, %s527_s20, %s528_s21  }
  0x14   :  { %524 = dma.done.wait [#allocation4], 512  }
  0x15   :  { %525 = vsyncadd [#allocation4], 4294966784  ;;  %v529_v1 = vmov 0.0   ;;  %vm530_vm0 = vmmov 0   ;;  %v531_v2 = vmov 0.0|0.0   ;;  %vm61_vm1 = vcmask 1043456  }
  0x16   :  { %436 = vmatprep.subr.mxu0 %v529_v1  ;;  %438 = vmatprep.mubr.msk.f32.mxu0 %vm530_vm0, %v529_v1  ;;  %vm57_vm2 = vcmask 31744   ;;  %v49_v3 = vld [vmem:[%s647_s1] sm:$0xf]  ;;  %v139_v6 = vld [vmem:[%s649_s3 + $0x8] sm:$0xff]  ;;  %v140_v8 = vld [vmem:[%s649_s3 + $0x10] sm:$0xff]  ;;  %vm149_vm4 = vcmask 261120  }
  0x17   :  { %474 = vmatprep.subr.bf16.mxu1 %v531_v2  ;;  %449 = vmatprep.mubr.msk.f32.mxu1 %vm530_vm0, %v529_v1  ;;  %v48_v4 = vld [vmem:[%s646_s0] sm:$0x3]  ;;  %v141_v9 = vld [vmem:[%s649_s3 + $0x18] sm:$0xff]  ;;  %v227_v12 = vld [vmem:[#allocation3 + $0x8] sm:$0xff]  ;;  %vm403_vm7 = vcmask 1024  }
  0x18   :  { %v138_v5 = vld [vmem:[%s649_s3] sm:$0xff]  ;;  %437 = vmatpush3.msk.msra.mxu0 %vm61_vm1, %v49_v3  ;;  %v478_v10 = vpack.c.bf16 %v141_v9, %v140_v8  ;;  %v228_v20 = vld [vmem:[#allocation3 + $0x10] sm:$0xff]  ;;  %v314_v24 = vld [vmem:[%s653_s7 + $0x8] sm:$0xff] }
  0x19   :  { %439 = vmatmul.mubr.msk.f32.vlgmr.msra.gmra.mrb[0].mxu0 %vm57_vm2, %v48_v4  ;;  %v475_v7 = vpack.c.bf16 %v139_v6, %v138_v5  ;;  %480 = vmatprep.subr.bf16.mxu0 %v531_v2  ;;  %v226_v11 = vld [vmem:[#allocation3] sm:$0xff]  ;;  %v410_v14 = vld [vmem:[%s648_s2] ss:$0 sm:$0xff]  ;;  %v315_v32 = vld [vmem:[%s653_s7 + $0x10] sm:$0xff] }
  0x1a   :  { %460 = vmatprep.mubr.msk.f32.mxu0 %vm530_vm0, %v529_v1  ;;  %v481_v13 = vpack.c.bf16 %v227_v12, %v226_v11  ;;  %v229_v21 = vld [vmem:[#allocation3 + $0x18] sm:$0xff] }
  0x1b   :  { %476 = vmatpush3.bf16.msra.mxu1 %v475_v7  ;;  %v484_v22 = vpack.c.bf16 %v229_v21, %v228_v20  ;;  %v313_v23 = vld [vmem:[%s653_s7] sm:$0xff]  ;;  %v316_v33 = vld [vmem:[%s653_s7 + $0x18] sm:$0xff] }
  0x1c   :  { %477 = vmatprep.subr.bf16.mxu1 %v531_v2  ;;  %482 = vmatpush3.bf16.msra.mxu0 %v481_v13  ;;  %v487_v25 = vpack.c.bf16 %v314_v24, %v313_v23  ;;  %v413_v26 = vld [vmem:[%s650_s4] ss:$0 sm:$0xff]  ;;  %v490_v34 = vpack.c.bf16 %v316_v33, %v315_v32 }
  0x1d   :  { %483 = vmatprep.subr.bf16.mxu0 %v531_v2  ;;  %v415_v35 = vld [vmem:[%s652_s6] ss:$0 sm:$0xff] }
  0x1e   :  { %v417_v41 = vld [vmem:[#allocation2] ss:$0 sm:$0xff] }
  0x1f   :  { %479 = vmatpush3.bf16.msra.mxu1 %v478_v10 }
  0x20   :  { %486 = vmatprep.subr.bf16.mxu1 %v531_v2  ;;  %485 = vmatpush3.bf16.msra.mxu0 %v484_v22 }
  0xec   :  { %v131_v15 = vpop.f32.mrb[0].mxu0 }
  0xed   :  { %v132_v16 = vadd.f32 %v410_v14, %v131_v15  ;;  %v440_v17 = vpop.f32.mrb[1].mxu0 }
  0xef   :  { %vm135_vm3 = vcmp.ge.f32.partialorder %v132_v16, 0.0  ;;  %v136_v18 = vmul.f32 0.1, %v132_v16 }
  0xf1   :  { %v137_v19 = vsel %vm135_vm3, %v132_v16, %v136_v18 }
  0xf2   :  { %450 = vmatmul.mubr.msk.f32.vlgmr.msra.gmra.mrb[0].mxu1 %vm149_vm4, %v137_v19 }
  0xf3   :  { %471 = vmatprep.mubr.msk.f32.mxu1 %vm530_vm0, %v529_v1  ;;  %488 = vmatpush3.bf16.msra.mxu1 %v487_v25 }
  0xf4   :  { %489 = vmatprep.subr.bf16.mxu1 %v531_v2 }
  0xf7   :  { %491 = vmatpush3.bf16.msra.mxu1 %v490_v34 }
 0x1c5   :  { %v219_v27 = vpop.f32.mrb[0].mxu1 }
 0x1c6   :  { %v220_v28 = vadd.f32 %v413_v26, %v219_v27  ;;  %v451_v29 = vpop.f32.mrb[1].mxu1 }
 0x1c8   :  { %vm223_vm5 = vcmp.ge.f32.partialorder %v220_v28, 0.0  ;;  %v224_v30 = vmul.f32 0.1, %v220_v28 }
 0x1ca   :  { %v225_v31 = vsel %vm223_vm5, %v220_v28, %v224_v30 }
 0x1cb   :  { %461 = vmatmul.mubr.msk.f32.vlgmr.msra.gmra.mrb[2].mxu0 %vm149_vm4, %v225_v31 }
 0x29e   :  { %v306_v36 = vpop.f32.mrb[2].mxu0 }
 0x29f   :  { %v307_v37 = vadd.f32 %v415_v35, %v306_v36  ;;  %v462_v38 = vpop.f32.mrb[3].mxu0 }
 0x2a1   :  { %vm310_vm6 = vcmp.ge.f32.partialorder %v307_v37, 0.0  ;;  %v311_v39 = vmul.f32 0.1, %v307_v37 }
 0x2a3   :  { %v312_v40 = vsel %vm310_vm6, %v307_v37, %v311_v39 }
 0x2a4   :  { %472 = vmatmul.mubr.msk.f32.vlgmr.msra.gmra.mrb[2].mxu1 %vm149_vm4, %v312_v40 }
 0x377   :  { %v393_v42 = vpop.f32.mrb[2].mxu1 }
 0x378   :  { %v394_v43 = vadd.f32 %v417_v41, %v393_v42  ;;  %v473_v44 = vpop.f32.mrb[3].mxu1 }
 0x37a   :  { %v397_v45 = vsub.f32 0.0, %v394_v43 }
 0x37c   :  { %v398_v46 = vmul.f32 1.442695, %v397_v45 }
 0x37e   :  { %498 = vpow2.f32 %v398_v46 }
 0x388   :  { %v499_v47 = vpop.eup %498 }
 0x389   :  { %v400_v48 = vadd.f32 1.0, %v499_v47 }
 0x38b   :  { %500 = vrcp.f32 %v400_v48 }
 0x395   :  { %v501_v49 = vpop.eup %500 }
 0x396   :  { %404 = vst.msk [vmem:[%s655_s9] sm:$0x3] %vm403_vm7, %v501_v49 }
 0x397   :  { %409 = vsyncpa [#allocation4], 1 }

</bundles_post_ra>
